<compile_context>
chip_gen: v7x
topology: tpu7x:2x2x1
jax: 0.10.0
libtpu: 0.0.40
codegen_flags: <defaults>
</compile_context>

<pallas_src>
import math

import jax
import jax.numpy as jnp
from jax.experimental import pallas as pl
from jax.experimental.pallas import tpu as pltpu

SEQ_LEN = 30                       # seq_len_human
PRE = 32                           # HIDDEN_DIM_PRE_ATTN_LSTM
POST = 64                          # HIDDEN_DIM_POST_ATTN_LSTM == hidden_size
CAT_DIM = PRE * 2 + POST           # 128
ATTN_IN = CAT_DIM * SEQ_LEN        # 3840 (only used by the pure-JAX reference)
OUTPUT_SIZE = 16                   # output_size (chosen small)


# ---------------------------------------------------------------------------
# Pallas kernel: one decoder timestep per grid iteration, h/c carried in VMEM.
# ---------------------------------------------------------------------------
def attn_decoder_step_kernel(inp_ref, h0_ref, c0_ref, wg_ref, bg_ref,
                             outw_ref, outb_ref,
                             out_ref, h_new_ref, c_new_ref,
                             h_sc, c_sc):
    t = pl.program_id(0)

    @pl.when(t == 0)
    def _():
        h_sc[...] = h0_ref[...]
        c_sc[...] = c0_ref[...]

    h = h_sc[...]                                               # (1, 64)
    c = c_sc[...]                                               # (1, 64)

    # softmax over the size-1 dim makes attn_weights identically 1.0, so
    # bmm(attn_weights, input.view(1,30,64)) == sum over the 30 positions.
    attn_applied = jnp.sum(inp_ref[...], axis=0, keepdims=True)  # (1, 64)

    # Fused LSTMCell: [x, h] @ [W_ih^T ; W_hh^T]  (gate columns permuted to [i,f,o,g]).
    xh = jnp.concatenate([attn_applied, h], axis=1)              # (1, 128)
    gates = (jnp.dot(xh, wg_ref[...], preferred_element_type=jnp.float32)
             + bg_ref[...])                                      # (1, 256)
    sig = jax.nn.sigmoid(gates[:, :3 * POST])                    # i | f | o in one slab
    i_g = sig[:, 0 * POST:1 * POST]
    f_g = sig[:, 1 * POST:2 * POST]
    o_g = sig[:, 2 * POST:3 * POST]
    g_g = jnp.tanh(gates[:, 3 * POST:4 * POST])
    c_new = f_g * c + i_g * g_g
    h_new = o_g * jnp.tanh(c_new)
    h_sc[...] = h_new
    c_sc[...] = c_new

    # output = log_softmax(Linear_64->out(h_new), dim=1) written to row t.
    logits = (jnp.dot(h_new, outw_ref[...], preferred_element_type=jnp.float32)
              + outb_ref[...])                                   # (1, out_size)
    m = jnp.max(logits, axis=1, keepdims=True)
    z = logits - m
    out_ref[pl.ds(t, 1), :] = z - jnp.log(jnp.sum(jnp.exp(z), axis=1, keepdims=True))

    h_new_ref[...] = h_new
    c_new_ref[...] = c_new


# ---------------------------------------------------------------------------
# Wrappers
# ---------------------------------------------------------------------------
def attn_decoder_decode(params, inp, hidden, cell_state, num_steps):
    """Run `num_steps` decoder timesteps in ONE pallas_call (weights stay resident).

    inp: (30, 1, 64); hidden/cell_state: reshape-able to (1, 64).
    Returns (outputs (num_steps, out_size), h_new (1,64), c_new (1,64)).
    """
    x = inp.reshape(SEQ_LEN, 2 * PRE).astype(jnp.float32)
    h = hidden.reshape(1, POST).astype(jnp.float32)
    c = cell_state.reshape(1, POST).astype(jnp.float32)
    out_size = params["outb"].shape[-1]

    out, h_new, c_new = pl.pallas_call(
        attn_decoder_step_kernel,
        out_shape=(
            jax.ShapeDtypeStruct((num_steps, out_size), jnp.float32),
            jax.ShapeDtypeStruct((1, POST), jnp.float32),
            jax.ShapeDtypeStruct((1, POST), jnp.float32),
        ),
        grid=(num_steps,),
        in_specs=[
            pl.BlockSpec((SEQ_LEN, 2 * PRE), lambda t: (0, 0)),     # input (resident)
            pl.BlockSpec((1, POST), lambda t: (0, 0)),              # h0
            pl.BlockSpec((1, POST), lambda t: (0, 0)),              # c0
            pl.BlockSpec((2 * POST, 4 * POST), lambda t: (0, 0)),   # fused gate weights
            pl.BlockSpec((1, 4 * POST), lambda t: (0, 0)),          # fused gate bias
            pl.BlockSpec((POST, out_size), lambda t: (0, 0)),       # out weights
            pl.BlockSpec((1, out_size), lambda t: (0, 0)),          # out bias
        ],
        out_specs=(
            pl.BlockSpec((num_steps, out_size), lambda t: (0, 0)),  # all steps, resident
            pl.BlockSpec((1, POST), lambda t: (0, 0)),
            pl.BlockSpec((1, POST), lambda t: (0, 0)),
        ),
        scratch_shapes=[
            pltpu.VMEM((1, POST), jnp.float32),                     # h carry
            pltpu.VMEM((1, POST), jnp.float32),                     # c carry
        ],
        compiler_params=pltpu.CompilerParams(
            dimension_semantics=("arbitrary",)),                    # sequential carry
    )(x, h, c, params["w_gates"], params["b_gates"],
      params["outw_t"], params["outb"])
    return out, h_new, c_new


def attn_decoder_forward(params, inp, hidden, cell_state, time_step):
    """Single step; matches AttnDecoderRNN.forward(input, hidden, cell_state, time_step)."""
    del time_step  # unused in the reference forward
    out, h_new, c_new = attn_decoder_decode(params, inp, hidden, cell_state, num_steps=1)
    return out, h_new, c_new   # out: (1, out_size)


# ---------------------------------------------------------------------------
# Params: raw torch-style init + packing into the fused kernel layout.
# ---------------------------------------------------------------------------
def init_params(key, hidden_size=POST, output_size=OUTPUT_SIZE):
    """torch-style U(-1/sqrt(fan_in), 1/sqrt(fan_in)) raw parameters."""
    ks = jax.random.split(key, 8)

    def u(k, shape, fan_in):
        bound = 1.0 / math.sqrt(fan_in)
        return jax.random.uniform(k, shape, jnp.float32, -bound, bound)

    return {
        "attn_w": u(ks[0], (SEQ_LEN, ATTN_IN), ATTN_IN),   # used only by the JAX reference
        "attn_b": u(ks[1], (SEQ_LEN,), ATTN_IN),           # (dead path: softmax == 1.0)
        "wih": u(ks[2], (4 * hidden_size, hidden_size), hidden_size),
        "whh": u(ks[3], (4 * hidden_size, hidden_size), hidden_size),
        "bih": u(ks[4], (4 * hidden_size,), hidden_size),
        "bhh": u(ks[5], (4 * hidden_size,), hidden_size),
        "outw": u(ks[6], (output_size, hidden_size), hidden_size),
        "outb": u(ks[7], (output_size,), hidden_size),
    }


def pack_params(raw, hidden_size=POST):
    """Fuse LSTM weights/biases and reorder gate columns i,f,g,o -> i,f,o,g."""
    H = hidden_size
    perm = jnp.concatenate([jnp.arange(0, H), jnp.arange(H, 2 * H),
                            jnp.arange(3 * H, 4 * H), jnp.arange(2 * H, 3 * H)])
    w_gates = jnp.concatenate([raw["wih"].T, raw["whh"].T], axis=0)[:, perm]  # (128, 256)
    b_gates = (raw["bih"] + raw["bhh"])[perm].reshape(1, 4 * H)               # (1, 256)
    return {
        "w_gates": w_gates,
        "b_gates": b_gates,
        "outw_t": raw["outw"].T,                         # (64, out_size)
        "outb": raw["outb"].reshape(1, -1),              # (1, out_size)
    }


# ---------------------------------------------------------------------------
# Pure-JAX transliteration of the PyTorch forward (keeps the literal dead path).
# ---------------------------------------------------------------------------
def ref_forward(raw, inp, hidden, cell_state, time_step):
    del time_step
    H = POST
    x = inp.reshape(SEQ_LEN, 2 * PRE)
    h = hidden.reshape(1, H)
    c = cell_state.reshape(1, H)
    cat = jnp.concatenate([x, jnp.tile(h, (SEQ_LEN, 1))], axis=1)            # (30, 128)
    attn_logits = cat.reshape(1, 1, -1) @ raw["attn_w"].T + raw["attn_b"]    # (1, 1, 30)
    attn_weights = jax.nn.softmax(attn_logits, axis=1)                       # size-1 dim -> 1.0
    attn_applied = jnp.matmul(attn_weights, x.reshape(1, SEQ_LEN, 2 * PRE))  # (1, 1, 64)
    a = attn_applied.reshape(1, H)
    gates = a @ raw["wih"].T + raw["bih"] + h @ raw["whh"].T + raw["bhh"]
    i_g = jax.nn.sigmoid(gates[:, 0:H])
    f_g = jax.nn.sigmoid(gates[:, H:2 * H])
    g_g = jnp.tanh(gates[:, 2 * H:3 * H])
    o_g = jax.nn.sigmoid(gates[:, 3 * H:4 * H])
    c_new = f_g * c + i_g * g_g
    h_new = o_g * jnp.tanh(c_new)
    logits = h_new @ raw["outw"].T + raw["outb"]
    return jax.nn.log_softmax(logits, axis=1), h_new, c_new


if __name__ == "__main__":
    key = jax.random.PRNGKey(0)
    pkey, ikey, hkey, ckey = jax.random.split(key, 4)
    raw = init_params(pkey)
    params = pack_params(raw)

    # input: (seq_len_human=30, 1, 2*PRE=64); hidden/cell: (1, 1, 64)
    inp = jax.random.normal(ikey, (SEQ_LEN, 1, 2 * PRE), jnp.float32)
    hidden = jax.random.normal(hkey, (1, 1, POST), jnp.float32)
    cell = jax.random.normal(ckey, (1, 1, POST), jnp.float32)

    # Single-step forward (matches AttnDecoderRNN.forward).
    output, h1, c1 = attn_decoder_forward(params, inp, hidden, cell, time_step=0)
    jax.block_until_ready((output, h1, c1))
    assert output.shape == (1, OUTPUT_SIZE)
    assert h1.shape == (1, POST) and c1.shape == (1, POST)

    ref_out, ref_h, ref_c = ref_forward(raw, inp, hidden, cell, 0)
    assert jnp.allclose(output, ref_out, atol=1e-3, rtol=1e-3)
    assert jnp.allclose(h1, ref_h, atol=1e-3, rtol=1e-3)
    assert jnp.allclose(c1, ref_c, atol=1e-3, rtol=1e-3)

    # Multi-step decode: T timesteps amortized inside a single gridded pallas_call.
    T = 5
    outs, hT, cT = attn_decoder_decode(params, inp, hidden, cell, num_steps=T)
    jax.block_until_ready((outs, hT, cT))
    assert outs.shape == (T, OUTPUT_SIZE)

    rh, rc = hidden, cell
    ref_rows = []
    for _ in range(T):
        ro, rh, rc = ref_forward(raw, inp, rh, rc, 0)
        ref_rows.append(ro)
    ref_rows = jnp.concatenate(ref_rows, axis=0)
    assert jnp.allclose(outs, ref_rows, atol=1e-3, rtol=1e-3)
    assert jnp.allclose(hT, rh, atol=1e-3, rtol=1e-3)
    assert jnp.allclose(cT, rc, atol=1e-3, rtol=1e-3)

    print("KERNEL_OK")
</pallas_src>

<mosaic_0001>
module attributes {stable_mosaic.version = 11 : i64} {
  func.func @attn_decoder_step_kernel(%arg0: i32, %arg1: memref<30x64xf32, #tpu.memory_space<vmem>>, %arg2: memref<1x64xf32, #tpu.memory_space<vmem>>, %arg3: memref<1x64xf32, #tpu.memory_space<vmem>>, %arg4: memref<128x256xf32, #tpu.memory_space<vmem>>, %arg5: memref<1x256xf32, #tpu.memory_space<vmem>>, %arg6: memref<64x16xf32, #tpu.memory_space<vmem>>, %arg7: memref<1x16xf32, #tpu.memory_space<vmem>>, %arg8: memref<1x16xf32, #tpu.memory_space<vmem>>, %arg9: memref<1x64xf32, #tpu.memory_space<vmem>>, %arg10: memref<1x64xf32, #tpu.memory_space<vmem>>, %arg11: memref<1x64xf32, #tpu.memory_space<vmem>>, %arg12: memref<1x64xf32, #tpu.memory_space<vmem>>) attributes {dimension_semantics = [#tpu.dimension_semantics<arbitrary>], iteration_bounds = array<i64: 1>, scalar_prefetch = 0 : i64, scratch_operands = 2 : i64, tpu.core_type = #tpu.core_type<tc>, window_params = [{pipeline_mode = #tpu.pipeline_mode<synchronous>, transform_indices = @transform_0, window_bounds = array<i64: 30, 64>}, {pipeline_mode = #tpu.pipeline_mode<synchronous>, transform_indices = @transform_1, window_bounds = array<i64: 1, 64>}, {pipeline_mode = #tpu.pipeline_mode<synchronous>, transform_indices = @transform_2, window_bounds = array<i64: 1, 64>}, {pipeline_mode = #tpu.pipeline_mode<synchronous>, transform_indices = @transform_3, window_bounds = array<i64: 128, 256>}, {pipeline_mode = #tpu.pipeline_mode<synchronous>, transform_indices = @transform_4, window_bounds = array<i64: 1, 256>}, {pipeline_mode = #tpu.pipeline_mode<synchronous>, transform_indices = @transform_5, window_bounds = array<i64: 64, 16>}, {pipeline_mode = #tpu.pipeline_mode<synchronous>, transform_indices = @transform_6, window_bounds = array<i64: 1, 16>}, {pipeline_mode = #tpu.pipeline_mode<synchronous>, transform_indices = @transform_7, window_bounds = array<i64: 1, 16>}, {pipeline_mode = #tpu.pipeline_mode<synchronous>, transform_indices = @transform_8, window_bounds = array<i64: 1, 64>}, {pipeline_mode = #tpu.pipeline_mode<synchronous>, transform_indices = @transform_9, window_bounds = array<i64: 1, 64>}]} {
    %c0_i32 = arith.constant 0 : i32
    %0 = arith.cmpi eq, %arg0, %c0_i32 : i32
    %1 = arith.extui %0 : i1 to i32
    %c0_i32_0 = arith.constant 0 : i32
    %2 = arith.cmpi ne, %1, %c0_i32_0 : i32
    scf.if %2 {
      %c0_28 = arith.constant 0 : index
      %c0_29 = arith.constant 0 : index
      %49 = vector.load %arg2[%c0_28, %c0_29] : memref<1x64xf32, #tpu.memory_space<vmem>>, vector<1x64xf32>
      %c0_30 = arith.constant 0 : index
      %c0_31 = arith.constant 0 : index
      %50 = vector.load %arg11[%c0_30, %c0_31] : memref<1x64xf32, #tpu.memory_space<vmem>>, vector<1x64xf32>
      tpu.vector_store %arg11[%c0_30, %c0_31], %49 {strides = array<i32>} : memref<1x64xf32, #tpu.memory_space<vmem>>, vector<1x64xf32>,
      %c0_32 = arith.constant 0 : index
      %c0_33 = arith.constant 0 : index
      %51 = vector.load %arg3[%c0_32, %c0_33] : memref<1x64xf32, #tpu.memory_space<vmem>>, vector<1x64xf32>
      %c0_34 = arith.constant 0 : index
      %c0_35 = arith.constant 0 : index
      %52 = vector.load %arg12[%c0_34, %c0_35] : memref<1x64xf32, #tpu.memory_space<vmem>>, vector<1x64xf32>
      tpu.vector_store %arg12[%c0_34, %c0_35], %51 {strides = array<i32>} : memref<1x64xf32, #tpu.memory_space<vmem>>, vector<1x64xf32>,
    } else {
    }
    %c0 = arith.constant 0 : index
    %c0_1 = arith.constant 0 : index
    %3 = vector.load %arg11[%c0, %c0_1] : memref<1x64xf32, #tpu.memory_space<vmem>>, vector<1x64xf32>
    %c0_2 = arith.constant 0 : index
    %c0_3 = arith.constant 0 : index
    %4 = vector.load %arg12[%c0_2, %c0_3] : memref<1x64xf32, #tpu.memory_space<vmem>>, vector<1x64xf32>
    %c0_4 = arith.constant 0 : index
    %c0_5 = arith.constant 0 : index
    %5 = vector.load %arg1[%c0_4, %c0_5] : memref<30x64xf32, #tpu.memory_space<vmem>>, vector<30x64xf32>
    %cst = arith.constant dense<0.000000e+00> : vector<64xf32>
    %6 = vector.multi_reduction <add>, %5, %cst [0] : vector<30x64xf32> to vector<64xf32>
    %7 = vector.shape_cast %6 : vector<64xf32> to vector<1x64xf32>
    %8 = tpu.concatenate %7, %3 in 1 : vector<1x64xf32>, vector<1x64xf32> -> vector<1x128xf32>
    %c0_6 = arith.constant 0 : index
    %c0_7 = arith.constant 0 : index
    %9 = vector.load %arg4[%c0_6, %c0_7] : memref<128x256xf32, #tpu.memory_space<vmem>>, vector<128x256xf32>
    %cst_8 = arith.constant dense<0.000000e+00> : vector<1x256xf32>
    %10 = tpu.matmul %8, %9, %cst_8 {dimension_numbers = #tpu.dot_dimension_numbers<[1], [0], [0], [1], [0, 0, 1, 1], [], []>} : vector<1x128xf32>, vector<128x256xf32>, vector<1x256xf32> -> vector<1x256xf32>
    %c0_9 = arith.constant 0 : index
    %c0_10 = arith.constant 0 : index
    %11 = vector.load %arg5[%c0_9, %c0_10] : memref<1x256xf32, #tpu.memory_space<vmem>>, vector<1x256xf32>
    %12 = arith.addf %10, %11 : vector<1x256xf32>
    %13 = vector.extract_strided_slice %12 {offsets = [0, 0], sizes = [1, 192], strides = [1, 1]} : vector<1x256xf32> to vector<1x192xf32>
    %14 = arith.negf %13 : vector<1x192xf32>
    %15 = math.exp %14 : vector<1x192xf32>
    %cst_11 = arith.constant 1.000000e+00 : f32
    %16 = vector.broadcast %cst_11 : f32 to vector<1x192xf32>
    %17 = arith.addf %16, %15 : vector<1x192xf32>
    %18 = arith.divf %16, %17 : vector<1x192xf32>
    %19 = vector.extract_strided_slice %18 {offsets = [0, 0], sizes = [1, 64], strides = [1, 1]} : vector<1x192xf32> to vector<1x64xf32>
    %20 = vector.extract_strided_slice %18 {offsets = [0, 64], sizes = [1, 64], strides = [1, 1]} : vector<1x192xf32> to vector<1x64xf32>
    %21 = vector.extract_strided_slice %18 {offsets = [0, 128], sizes = [1, 64], strides = [1, 1]} : vector<1x192xf32> to vector<1x64xf32>
    %22 = vector.extract_strided_slice %12 {offsets = [0, 192], sizes = [1, 64], strides = [1, 1]} : vector<1x256xf32> to vector<1x64xf32>
    %23 = math.tanh %22 : vector<1x64xf32>
    %24 = arith.mulf %20, %4 : vector<1x64xf32>
    %25 = arith.mulf %19, %23 : vector<1x64xf32>
    %26 = arith.addf %24, %25 : vector<1x64xf32>
    %27 = math.tanh %26 : vector<1x64xf32>
    %28 = arith.mulf %21, %27 : vector<1x64xf32>
    %c0_12 = arith.constant 0 : index
    %c0_13 = arith.constant 0 : index
    %29 = vector.load %arg11[%c0_12, %c0_13] : memref<1x64xf32, #tpu.memory_space<vmem>>, vector<1x64xf32>
    tpu.vector_store %arg11[%c0_12, %c0_13], %28 {strides = array<i32>} : memref<1x64xf32, #tpu.memory_space<vmem>>, vector<1x64xf32>,
    %c0_14 = arith.constant 0 : index
    %c0_15 = arith.constant 0 : index
    %30 = vector.load %arg12[%c0_14, %c0_15] : memref<1x64xf32, #tpu.memory_space<vmem>>, vector<1x64xf32>
    tpu.vector_store %arg12[%c0_14, %c0_15], %26 {strides = array<i32>} : memref<1x64xf32, #tpu.memory_space<vmem>>, vector<1x64xf32>,
    %c0_16 = arith.constant 0 : index
    %c0_17 = arith.constant 0 : index
    %31 = vector.load %arg6[%c0_16, %c0_17] : memref<64x16xf32, #tpu.memory_space<vmem>>, vector<64x16xf32>
    %cst_18 = arith.constant dense<0.000000e+00> : vector<1x16xf32>
    %32 = tpu.matmul %28, %31, %cst_18 {dimension_numbers = #tpu.dot_dimension_numbers<[1], [0], [0], [1], [0, 0, 1, 1], [], []>} : vector<1x64xf32>, vector<64x16xf32>, vector<1x16xf32> -> vector<1x16xf32>
    %c0_19 = arith.constant 0 : index
    %c0_20 = arith.constant 0 : index
    %33 = vector.load %arg7[%c0_19, %c0_20] : memref<1x16xf32, #tpu.memory_space<vmem>>, vector<1x16xf32>
    %34 = arith.addf %32, %33 : vector<1x16xf32>
    %cst_21 = arith.constant dense<0xFF800000> : vector<1xf32>
    %35 = vector.multi_reduction <maximumf>, %34, %cst_21 [1] : vector<1x16xf32> to vector<1xf32>
    %36 = vector.shape_cast %35 : vector<1xf32> to vector<1x1xf32>
    %37 = vector.broadcast %36 : vector<1x1xf32> to vector<1x16xf32>
    %38 = arith.subf %34, %37 : vector<1x16xf32>
    %39 = math.exp %38 : vector<1x16xf32>
    %cst_22 = arith.constant dense<0.000000e+00> : vector<1xf32>
    %40 = vector.multi_reduction <add>, %39, %cst_22 [1] : vector<1x16xf32> to vector<1xf32>
    %41 = vector.shape_cast %40 : vector<1xf32> to vector<1x1xf32>
    %42 = math.log %41 : vector<1x1xf32>
    %43 = vector.broadcast %42 : vector<1x1xf32> to vector<1x16xf32>
    %44 = arith.subf %38, %43 : vector<1x16xf32>
    %45 = arith.index_cast %arg0 : i32 to index
    %c0_23 = arith.constant 0 : index
    %46 = vector.load %arg8[%45, %c0_23] : memref<1x16xf32, #tpu.memory_space<vmem>>, vector<1x16xf32>
    tpu.vector_store %arg8[%45, %c0_23], %44 {strides = array<i32>} : memref<1x16xf32, #tpu.memory_space<vmem>>, vector<1x16xf32>,
    %c0_24 = arith.constant 0 : index
    %c0_25 = arith.constant 0 : index
    %47 = vector.load %arg9[%c0_24, %c0_25] : memref<1x64xf32, #tpu.memory_space<vmem>>, vector<1x64xf32>
    tpu.vector_store %arg9[%c0_24, %c0_25], %28 {strides = array<i32>} : memref<1x64xf32, #tpu.memory_space<vmem>>, vector<1x64xf32>,
    %c0_26 = arith.constant 0 : index
    %c0_27 = arith.constant 0 : index
    %48 = vector.load %arg10[%c0_26, %c0_27] : memref<1x64xf32, #tpu.memory_space<vmem>>, vector<1x64xf32>
    tpu.vector_store %arg10[%c0_26, %c0_27], %26 {strides = array<i32>} : memref<1x64xf32, #tpu.memory_space<vmem>>, vector<1x64xf32>,
    return
  }
  func.func @transform_0(%arg0: i32) -> (i32, i32) {
    %c0_i32 = arith.constant 0 : i32
    %c0_i32_0 = arith.constant 0 : i32
    %c0_i32_1 = arith.constant 0 : i32
    return %c0_i32, %c0_i32_0 : i32, i32
  }
  func.func @transform_1(%arg0: i32) -> (i32, i32) {
    %c0_i32 = arith.constant 0 : i32
    %c0_i32_0 = arith.constant 0 : i32
    %c0_i32_1 = arith.constant 0 : i32
    return %c0_i32, %c0_i32_0 : i32, i32
  }
  func.func @transform_2(%arg0: i32) -> (i32, i32) {
    %c0_i32 = arith.constant 0 : i32
    %c0_i32_0 = arith.constant 0 : i32
    %c0_i32_1 = arith.constant 0 : i32
    return %c0_i32, %c0_i32_0 : i32, i32
  }
  func.func @transform_3(%arg0: i32) -> (i32, i32) {
    %c0_i32 = arith.constant 0 : i32
    %c0_i32_0 = arith.constant 0 : i32
    %c0_i32_1 = arith.constant 0 : i32
    return %c0_i32, %c0_i32_0 : i32, i32
  }
  func.func @transform_4(%arg0: i32) -> (i32, i32) {
    %c0_i32 = arith.constant 0 : i32
    %c0_i32_0 = arith.constant 0 : i32
    %c0_i32_1 = arith.constant 0 : i32
    return %c0_i32, %c0_i32_0 : i32, i32
  }
  func.func @transform_5(%arg0: i32) -> (i32, i32) {
    %c0_i32 = arith.constant 0 : i32
    %c0_i32_0 = arith.constant 0 : i32
    %c0_i32_1 = arith.constant 0 : i32
    return %c0_i32, %c0_i32_0 : i32, i32
  }
  func.func @transform_6(%arg0: i32) -> (i32, i32) {
    %c0_i32 = arith.constant 0 : i32
    %c0_i32_0 = arith.constant 0 : i32
    %c0_i32_1 = arith.constant 0 : i32
    return %c0_i32, %c0_i32_0 : i32, i32
  }
  func.func @transform_7(%arg0: i32) -> (i32, i32) {
    %c0_i32 = arith.constant 0 : i32
    %c0_i32_0 = arith.constant 0 : i32
    %c0_i32_1 = arith.constant 0 : i32
    return %c0_i32, %c0_i32_0 : i32, i32
  }
  func.func @transform_8(%arg0: i32) -> (i32, i32) {
    %c0_i32 = arith.constant 0 : i32
    %c0_i32_0 = arith.constant 0 : i32
    %c0_i32_1 = arith.constant 0 : i32
    return %c0_i32, %c0_i32_0 : i32, i32
  }
  func.func @transform_9(%arg0: i32) -> (i32, i32) {
    %c0_i32 = arith.constant 0 : i32
    %c0_i32_0 = arith.constant 0 : i32
    %c0_i32_1 = arith.constant 0 : i32
    return %c0_i32, %c0_i32_0 : i32, i32
  }
}

</mosaic_0001>

<bundles_post_ra>
// kernel: tpu_custom_call.1
= control target key start
LH: loop header
LB: loop body
LE: loop exit
PB: predicated region body
PF: predicated region fallthrough
CT: control target
= control target key end

     0   :  { %15 = vsyncpa [#allocation5], 0  ;;  %s759_s0 = inlined_call_operand.vmem [shape: f32[30,64], index: 0, kind: input, shape index: {}]   ;;  %s760_s1 = inlined_call_operand.vmem [shape: f32[1,64], index: 1, kind: input, shape index: {}]   ;;  %s761_s2 = inlined_call_operand.vmem [shape: f32[1,64], index: 2, kind: input, shape index: {}]   ;;  %s762_s3 = inlined_call_operand.hbm [shape: f32[128,256], index: 3, kind: input, shape index: {}]   ;;  %s763_s4 = inlined_call_operand.vmem [shape: f32[1,256], index: 4, kind: input, shape index: {}]   ;;  %s764_s5 = inlined_call_operand.vmem [shape: f32[64,16], index: 5, kind: input, shape index: {}]   ;;  %s765_s6 = inlined_call_operand.vmem [shape: f32[1,16], index: 6, kind: input, shape index: {}]   ;;  %s766_s7 = inlined_call_operand.hbm [shape: f32[1,16], index: 7, kind: output, shape index: {0}]   ;;  %s767_s8 = inlined_call_operand.hbm [shape: f32[1,64], index: 8, kind: output, shape index: {1}]   ;;  %s768_s9 = inlined_call_operand.hbm [shape: f32[1,64], index: 9, kind: output, shape index: {2}]  }
   0x1   :  { %16 = vsyncpa [#allocation6], 0 }
   0x2   :  { %17 = vsyncpa [#allocation9], 0  ;;  %s581_s30 = smov [#allocation4]   ;;  %s487_s13 = scalar_lea.hbm %s762_s3, 4096 }
   0x3   :  { %s29_s10 = sshll.u32 %s581_s30, 4  ;;  %p488_p0 = scmp.ne.s32.totalorder %s762_s3, %s487_s13  ;;  %s30_s10 = int_to_ptr.vmem [resolvable:$true] %s29_s10 }
   0x4   :  { %p491_p1 = scmp.lt.u32.totalorder %s487_s13, %s762_s3 }
   0x6   :  { %p493_p2 = pnand %p491_p1, %p488_p0 }
   0x8   :  { %496 = shalt.err (!%p493_p2)
}
   0x9   :  { %s497_s18 = scalar_lea.vmem %s30_s10, 4096  ;;  %p502_p4 = scmp.lt.s32.totalorder %s30_s10, %s30_s10 }
   0xa   :  { %p498_p3 = scmp.ne.s32.totalorder %s30_s10, %s497_s18  ;;  %p503_p5 = scmp.lt.s32.totalorder %s497_s18, %s497_s18 }
   0xc   :  { %p504_p6 = por %p503_p5, %p502_p4 }
   0xe   :  { %p505_p7 = pnand %p504_p6, %p498_p3 }
  0x10   :  { %508 = shalt.err (!%p505_p7)
}
  0x11   :  { %s582_s19 = smov 256   ;;  %s583_s20 = smov 16  }
  0x12   :  { %35 = dma.hbm_to_vmem [thread:$0]  %s762_s3, 4096, %s30_s10, [#allocation5], %s582_s19, %s582_s19, %s583_s20  }
  0x13   :  { %575 = dma.done.wait [#allocation5], 4096  }
  0x14   :  { %576 = vsyncadd [#allocation5], 4294963200  ;;  %v584_v0 = vmov 0.0   ;;  %vm50_vm0 = vcmask 516096   ;;  %v49_v1 = vld [vmem:[%s760_s1] sm:$0x1] }
  0x15   :  { %192 = vmatprep.mubr.f32.mxu0 %v584_v0  ;;  %v85_v2 = vld [vmem:[#allocation4 + $0x8] sm:$0xff]  ;;  %v87_v3 = vld [vmem:[#allocation4 + $0x18] sm:$0xff]  ;;  %51 = vst.msk [vmem:[#allocation2] sm:$0x1] %vm50_vm0, %v49_v1  ;;  %v84_v5 = vld [vmem:[#allocation4] sm:$0xff]  ;;  %s585_s1 = smov 64  }
  0x16   :  { %v417_v4 = vpack.c.bf16 %v87_v3, %v85_v2  ;;  %v86_v6 = vld [vmem:[#allocation4 + $0x10] sm:$0xff]  ;;  %v89_v7 = vld [vmem:[#allocation4 + $0x28] sm:$0xff]  ;;  %v91_v9 = vld [vmem:[#allocation4 + $0x38] sm:$0xff]  ;;  %vm60_vm1 = vcmask 523264   ;;  %vm66_vm2 = vcmask 521216   ;;  %vm587_vm3 = vmmov 0  }
  0x17   :  { %v419_v8 = vpack.c.bf16 %v86_v6, %v84_v5  ;;  %v88_v10 = vld [vmem:[#allocation4 + $0x20] sm:$0xff]  ;;  %v90_v11 = vld [vmem:[#allocation4 + $0x30] sm:$0xff]  ;;  %v421_v12 = vpack.c.bf16 %v91_v9, %v89_v7  ;;  %v93_v13 = vld [vmem:[#allocation4 + $0x48] sm:$0xff]  ;;  %v118_v9 = vlaneseq  ;;  %414 = vmatprep.mubr.msk.f32.mxu1 %vm587_vm3, %v584_v0  ;;  %vm326_vm4 = vcmask 122880   ;;  %s588_s27 = smov [#allocation8]  }
  0x18   :  { %418 = vmatprep.subr.bf16.mxu0 %v417_v4  ;;  %v95_v14 = vld [vmem:[#allocation4 + $0x58] sm:$0xff]  ;;  %v423_v15 = vpack.c.bf16 %v90_v11, %v88_v10  ;;  %v92_v17 = vld [vmem:[#allocation4 + $0x40] sm:$0xff]  ;;  %v94_v18 = vld [vmem:[#allocation4 + $0x50] sm:$0xff]  ;;  %s358_s28 = sshll.u32 %s588_s27, 4  ;;  %s359_s28 = int_to_ptr.vmem [resolvable:$true] %s358_s28 }
  0x19   :  { %420 = vmatpush1.bf16.msra.mxu0 %v419_v8  ;;  %v425_v16 = vpack.c.bf16 %v95_v14, %v93_v13  ;;  %v97_v19 = vld [vmem:[#allocation4 + $0x68] sm:$0xff]  ;;  %v99_v20 = vld [vmem:[#allocation4 + $0x78] sm:$0xff]  ;;  %v427_v22 = vpack.c.bf16 %v94_v18, %v92_v17  ;;  %v96_v24 = vld [vmem:[#allocation4 + $0x60] sm:$0xff]  ;;  %v119_v10 = vshrl.u32 %v118_v9, 7  ;;  %s513_s29 = scalar_lea.vmem %s359_s28, 32  ;;  %p514_p9 = scmp.lt.s32.totalorder %s359_s28, %s359_s28 }
  0x1a   :  { %422 = vmatprep.subr.bf16.mxu0 %v421_v12  ;;  %v429_v23 = vpack.c.bf16 %v99_v20, %v97_v19  ;;  %v98_v25 = vld [vmem:[#allocation4 + $0x70] sm:$0xff]  ;;  %v101_v26 = vld [vmem:[#allocation4 + $0x88] sm:$0xff]  ;;  %v103_v27 = vld [vmem:[#allocation4 + $0x98] sm:$0xff] }
  0x1b   :  { %v431_v28 = vpack.c.bf16 %v98_v25, %v96_v24  ;;  %v433_v29 = vpack.c.bf16 %v103_v27, %v101_v26  ;;  %v100_v30 = vld [vmem:[#allocation4 + $0x80] sm:$0xff]  ;;  %v102_v31 = vld [vmem:[#allocation4 + $0x90] sm:$0xff]  ;;  %v52_v32 = vld [vmem:[%s761_s2] sm:$0x1]  ;;  %v124_v11 = vsub.s32 1, %v119_v10  ;;  %v120_v18 = vsub.s32 0, %v119_v10 }
  0x1c   :  { %v384_v21 = vld [vmem:[#allocation2] ss:$0 sm:$0xff]  ;;  %v105_v33 = vld [vmem:[#allocation4 + $0xa8] sm:$0xff]  ;;  %53 = vst.msk [vmem:[#allocation3] sm:$0x1] %vm50_vm0, %v52_v32  ;;  %v435_v35 = vpack.c.bf16 %v102_v31, %v100_v30  ;;  %v104_v37 = vld [vmem:[#allocation4 + $0xa0] sm:$0xff] }
  0x1d   :  { %424 = vmatpush1.bf16.msra.mxu0 %v423_v15  ;;  %80 = vrot.lane.b32.xlu0 %v384_v21, %s585_s1  ;;  %v107_v34 = vld [vmem:[#allocation4 + $0xb8] sm:$0xff]  ;;  %v106_v38 = vld [vmem:[#allocation4 + $0xb0] sm:$0xff]  ;;  %v109_v39 = vld [vmem:[#allocation4 + $0xc8] sm:$0xff]  ;;  %v586_v30 = vmov 0.0|0.0  }
  0x1e   :  { %426 = vmatprep.subr.bf16.mxu0 %v425_v16  ;;  %v437_v36 = vpack.c.bf16 %v107_v34, %v105_v33  ;;  %v111_v40 = vld [vmem:[#allocation4 + $0xd8] sm:$0xff]  ;;  %v439_v41 = vpack.c.bf16 %v106_v38, %v104_v37  ;;  %v108_v43 = vld [vmem:[#allocation4 + $0xc0] sm:$0xff]  ;;  %v110_v44 = vld [vmem:[#allocation4 + $0xd0] sm:$0xff]  ;;  %449 = vmatprep.subr.bf16.mxu1 %v586_v30 }
  0x1f   :  { %v441_v42 = vpack.c.bf16 %v111_v40, %v109_v39  ;;  %v113_v46 = vld [vmem:[#allocation4 + $0xe8] sm:$0xff]  ;;  %v115_v47 = vld [vmem:[#allocation4 + $0xf8] sm:$0xff]  ;;  %v443_v48 = vpack.c.bf16 %v110_v44, %v108_v43  ;;  %v112_v50 = vld [vmem:[#allocation4 + $0xe0] sm:$0xff] }
  0x20   :  { %v445_v49 = vpack.c.bf16 %v115_v47, %v113_v46  ;;  %v114_v51 = vld [vmem:[#allocation4 + $0xf0] sm:$0xff]  ;;  %v56_v53 = vld [vmem:[%s759_s0] sm:$0xff]  ;;  %v57_v54 = vld [vmem:[%s759_s0 + $0x8] sm:$0xff] }
  0x21   :  { %428 = vmatpush1.bf16.msra.mxu0 %v427_v22  ;;  %v447_v52 = vpack.c.bf16 %v114_v51, %v112_v50  ;;  %v61_v55 = vsel %vm60_vm1, %v56_v53, 0.0  ;;  %v62_v56 = vsel %vm60_vm1, %v57_v54, 0.0  ;;  %v58_v57 = vld [vmem:[%s759_s0 + $0x10] sm:$0xff]  ;;  %v59_v60 = vld [vmem:[%s759_s0 + $0x18] sm:$0x3f]  ;;  %v244_v27 = vld [vmem:[%s764_s5] sm:$0xff] }
  0x22   :  { %430 = vmatprep.subr.bf16.mxu0 %v429_v23  ;;  %v63_v58 = vadd.f32 %v62_v56, %v61_v55  ;;  %v64_v59 = vsel %vm60_vm1, %v58_v57, 0.0  ;;  %v67_v62 = vsel %vm66_vm2, %v59_v60, 0.0  ;;  %v116_v12 = vld [vmem:[%s763_s4] sm:$0x3]  ;;  %v247_v32 = vld [vmem:[%s764_s5 + $0x18] sm:$0xff]  ;;  %v250_v37 = vld [vmem:[%s764_s5 + $0x30] sm:$0xff] }
  0x23   :  { %v387_v45 = vld [vmem:[#allocation3] ss:$0 sm:$0xff]  ;;  %v125_v13 = vrot.slane %v116_v12, %v124_v11  ;;  %v121_v19 = vrot.slane %v116_v12, %v120_v18  ;;  %v251_v38 = vld [vmem:[%s764_s5 + $0x38] sm:$0xff]  ;;  %v252_v0 = vld [vmem:[%s765_s6] sm:$0x1]  ;;  %s509_s6 = scalar_lea.vmem %s359_s28, 16 }
  0x24   :  { %217 = vrot.lane.b32.xlu1 %v387_v45, %s585_s1  ;;  %v65_v61 = vadd.f32 %v64_v59, %v63_v58  ;;  %v248_v34 = vld [vmem:[%s764_s5 + $0x20] sm:$0xff]  ;;  %v459_v39 = vpack.c.bf16 %v251_v38, %v250_v37  ;;  %p510_p8 = scmp.ne.s32.totalorder %s359_s28, %s509_s6  ;;  %p515_p10 = scmp.lt.s32.totalorder %s513_s29, %s509_s6 }
  0x25   :  { %432 = vmatpush1.bf16.msra.mxu0 %v431_v28  ;;  %v245_v28 = vld [vmem:[%s764_s5 + $0x8] sm:$0xff] }
  0x26   :  { %434 = vmatprep.subr.bf16.mxu0 %v433_v29  ;;  %v68_v63 = vadd.f32 %v67_v62, %v65_v61  ;;  %v246_v29 = vld [vmem:[%s764_s5 + $0x10] sm:$0xff]  ;;  %v450_v31 = vpack.c.bf16 %v245_v28, %v244_v27  ;;  %p516_p11 = por %p515_p10, %p514_p9 }
  0x27   :  { %v453_v33 = vpack.c.bf16 %v247_v32, %v246_v29 }
  0x28   :  { %v69_v1 = vrot.slane %v68_v63, 4  ;;  %451 = vmatpush3.bf16.msra.mxu1 %v450_v31  ;;  %p517_p12 = pnand %p516_p11, %p510_p8 }
  0x29   :  { %436 = vmatpush1.bf16.msra.mxu0 %v435_v35  ;;  %452 = vmatprep.subr.bf16.mxu1 %v586_v30  ;;  %v249_v35 = vld [vmem:[%s764_s5 + $0x28] sm:$0xff] }
  0x2a   :  { %438 = vmatprep.subr.bf16.mxu0 %v437_v36  ;;  %v70_v2 = vadd.f32 %v69_v1, %v68_v63  ;;  %v456_v36 = vpack.c.bf16 %v249_v35, %v248_v34 }
  0x2c   :  { %v71_v3 = vrot.slane %v70_v2, 2  ;;  %454 = vmatpush3.bf16.msra.mxu1 %v453_v33 }
  0x2d   :  { %440 = vmatpush1.bf16.msra.mxu0 %v439_v41  ;;  %455 = vmatprep.subr.bf16.mxu1 %v586_v30 }
  0x2e   :  { %442 = vmatprep.subr.bf16.mxu0 %v441_v42  ;;  %v72_v4 = vadd.f32 %v71_v3, %v70_v2 }
  0x30   :  { %v73_v5 = vrot.slane %v72_v4, 1  ;;  %457 = vmatpush3.bf16.msra.mxu1 %v456_v36 }
  0x31   :  { %444 = vmatpush1.bf16.msra.mxu0 %v443_v48  ;;  %458 = vmatprep.subr.bf16.mxu1 %v586_v30 }
  0x32   :  { %446 = vmatprep.subr.bf16.mxu0 %v445_v49  ;;  %v74_v6 = vadd.f32 %v73_v5, %v72_v4 }
  0x34   :  { %460 = vmatpush3.bf16.msra.mxu1 %v459_v39 }
  0x35   :  { %448 = vmatpush1.bf16.msra.mxu0 %v447_v52 }
  0x8f   :  { %v81_v7 = vpop.permute.xlu0 %80 }
  0x90   :  { %v83_v8 = vsel %vm60_vm1, %v74_v6, %v81_v7 }
  0x91   :  { %193 = vmatmul.mubr.f32.vlgmr.msra.gmra.mrb[0].mxu0 %v83_v8 }
  0x96   :  { %v218_v40 = vpop.permute.xlu1 %217 }
 0x164   :  { %v194_v14 = vpop.f32.mrb[0].mxu0 }
 0x165   :  { %v196_v15 = vpop.f32.mrb[1].mxu0  ;;  %v195_v20 = vadd.f32 %v194_v14, %v121_v19 }
 0x166   :  { %v197_v16 = vadd.f32 %v196_v15, %v125_v13 }
 0x167   :  { %v385_v21 = vmul.f32 -1.442695, %v195_v20 }
 0x168   :  { %471 = vtanh.f32 %v197_v16  ;;  %v386_v45 = vmul.f32 -1.442695, %v197_v16 }
 0x169   :  { %473 = vpow2.f32 %v385_v21 }
 0x172   :  { %v472_v17 = vpop.eup %471 }
 0x173   :  { %222 = vrot.lane.b32.xlu0 %v472_v17, %s585_s1  ;;  %v474_v22 = vpop.eup %473 }
 0x174   :  { %v205_v23 = vadd.f32 1.0, %v474_v22 }
 0x176   :  { %475 = vrcp.f32 %v205_v23 }
 0x180   :  { %v476_v24 = vpop.eup %475 }
 0x181   :  { %v220_v41 = vmul.f32 %v476_v24, %v218_v40 }
 0x1e5   :  { %v223_v25 = vpop.permute.xlu0 %222 }
 0x1e6   :  { %v225_v26 = vmul.f32 %v476_v24, %v223_v25 }
 0x1e8   :  { %227 = vrot.lane.b32.xlu1 %v225_v26, %s585_s1 }
 0x25a   :  { %v228_v42 = vpop.permute.xlu1 %227 }
 0x25b   :  { %v230_v43 = vadd.f32 %v228_v42, %v220_v41 }
 0x25d   :  { %477 = vtanh.f32 %v230_v43 }
 0x25e   :  { %479 = vpow2.f32 %v386_v45 }
 0x267   :  { %v478_v44 = vpop.eup %477 }
 0x268   :  { %233 = vrot.lane.b32.xlu0 %v478_v44, %s585_s1  ;;  %v480_v46 = vpop.eup %479 }
 0x269   :  { %v206_v47 = vadd.f32 1.0, %v480_v46 }
 0x26b   :  { %481 = vrcp.f32 %v206_v47 }
 0x275   :  { %v482_v48 = vpop.eup %481 }
 0x2da   :  { %v234_v49 = vpop.permute.xlu0 %233 }
 0x2db   :  { %v236_v50 = vmul.f32 %v482_v48, %v234_v49 }
 0x2dd   :  { %238 = vst.msk [vmem:[#allocation2] sm:$0x1] %vm50_vm0, %v236_v50  ;;  %340 = vst.msk [vmem:[#allocation8] sm:$0x1] %vm50_vm0, %v236_v50  ;;  %415 = vmatmul.mubr.msk.f32.vlgmr.msra.gmra.mrb[0].mxu1 %vm60_vm1, %v236_v50 }
 0x3b0   :  { %v322_v51 = vpop.f32.mrb[0].mxu1 }
 0x3b1   :  { %v323_v52 = vadd.f32 %v322_v51, %v252_v0  ;;  %v416_v53 = vpop.f32.mrb[1].mxu1 }
 0x3b3   :  { %v327_v54 = vsel %vm326_vm4, %v323_v52, -inf }
 0x3b4   :  { %328 = vmax.xlane.f32.xlu1 %v327_v54 }
 0x441   :  { %v329_v55 = vpop.xlane.xlu1 %328 }
 0x442   :  { %v330_v56 = vsub.f32 %v323_v52, %v329_v55 }
 0x444   :  { %v331_v57 = vmul.f32 1.442695, %v330_v56 }
 0x446   :  { %483 = vpow2.f32 %v331_v57 }
 0x450   :  { %v484_v58 = vpop.eup %483 }
 0x451   :  { %v333_v59 = vsel %vm326_vm4, %v484_v58, 0.0 }
 0x452   :  { %334 = vadd.xlane.f32.xlu0 %v333_v59 }
 0x468   :  { %240 = vrot.lane.b32.xlu0 %v230_v43, %s585_s1 }
 0x469   :  { %520 = shalt.err (!%p517_p12)
}
 0x46a   :  { %s521_s11 = scalar_lea.hbm %s767_s8, 16 }
 0x46b   :  { %p522_p13 = scmp.ne.s32.totalorder %s767_s8, %s521_s11  ;;  %p525_p0 = scmp.lt.u32.totalorder %s521_s11, %s767_s8 }
 0x46d   :  { %p527_p1 = pnand %p525_p0, %p522_p13 }
 0x46f   :  { %530 = shalt.err (!%p527_p1)
}
 0x470   :  { %361 = dma.vmem_to_hbm [thread:$0]  %s359_s28, 16, %s767_s8, [#allocation9]  }
 0x471   :  { %s589_s15 = smov [#allocation10]  }
 0x472   :  { %s368_s16 = sshll.u32 %s589_s15, 4  ;;  %s369_s16 = int_to_ptr.vmem [resolvable:$true] %s368_s16 }
 0x473   :  { %s531_s17 = scalar_lea.vmem %s369_s16, 16  ;;  %s535_s18 = scalar_lea.vmem %s369_s16, 32 }
 0x474   :  { %p532_p2 = scmp.ne.s32.totalorder %s369_s16, %s531_s17  ;;  %p536_p3 = scmp.lt.s32.totalorder %s369_s16, %s369_s16 }
 0x475   :  { %p537_p4 = scmp.lt.s32.totalorder %s535_s18, %s531_s17 }
 0x477   :  { %p538_p5 = por %p537_p4, %p536_p3 }
 0x479   :  { %p539_p6 = pnand %p538_p5, %p532_p2 }
 0x4df   :  { %v335_v60 = vpop.xlane.xlu0 %334 }
 0x4e0   :  { %485 = vlog2.f32 %v335_v60 }
 0x4e3   :  { %v241_v61 = vpop.permute.xlu0 %240 }
 0x4e4   :  { %243 = vst.msk [vmem:[#allocation3] sm:$0x1] %vm50_vm0, %v241_v61  ;;  %341 = vst.msk [vmem:[#allocation10] sm:$0x1] %vm50_vm0, %v241_v61 }
 0x4e5   :  { %542 = shalt.err (!%p539_p6)
}
 0x4e6   :  { %s543_s20 = scalar_lea.hbm %s768_s9, 16 }
 0x4e7   :  { %p544_p7 = scmp.ne.s32.totalorder %s768_s9, %s543_s20  ;;  %p547_p8 = scmp.lt.u32.totalorder %s543_s20, %s768_s9 }
 0x4e9   :  { %p549_p9 = pnand %p547_p8, %p544_p7 }
 0x4eb   :  { %552 = shalt.err (!%p549_p9)
}
 0x4ec   :  { %371 = dma.vmem_to_hbm [thread:$0]  %s369_s16, 16, %s768_s9, [#allocation9]   ;;  %v486_v62 = vpop.eup %485 }
 0x4ed   :  { %s590_s2 = smov [#allocation7]   ;;  %v337_v63 = vmul.f32 0.6931472, %v486_v62 }
 0x4ee   :  { %s348_s5 = sshll.u32 %s590_s2, 4  ;;  %s349_s5 = int_to_ptr.vmem [resolvable:$true] %s348_s5 }
 0x4ef   :  { %v338_v1 = vsub.f32 %v330_v56, %v337_v63  ;;  %s553_s26 = scalar_lea.vmem %s349_s5, 16  ;;  %s557_s27 = scalar_lea.vmem %s349_s5, 32 }
 0x4f0   :  { %p554_p10 = scmp.ne.s32.totalorder %s349_s5, %s553_s26  ;;  %p558_p11 = scmp.lt.s32.totalorder %s349_s5, %s349_s5 }
 0x4f1   :  { %339 = vst.msk [vmem:[#allocation7] sm:$0x1] %vm326_vm4, %v338_v1  ;;  %p559_p12 = scmp.lt.s32.totalorder %s557_s27, %s553_s26 }
 0x4f3   :  { %p560_p13 = por %p559_p12, %p558_p11 }
 0x4f5   :  { %p561_p0 = pnand %p560_p13, %p554_p10 }
 0x4f7   :  { %564 = shalt.err (!%p561_p0)
}
 0x4f8   :  { %s565_s9 = scalar_lea.hbm %s766_s7, 16 }
 0x4f9   :  { %p566_p1 = scmp.ne.s32.totalorder %s766_s7, %s565_s9  ;;  %p569_p2 = scmp.lt.u32.totalorder %s565_s9, %s766_s7 }
 0x4fb   :  { %p571_p3 = pnand %p569_p2, %p566_p1 }
 0x4fd   :  { %574 = shalt.err (!%p571_p3)
}
 0x4fe   :  { %351 = dma.vmem_to_hbm [thread:$0]  %s349_s5, 16, %s766_s7, [#allocation6]  }
 0x4ff   :  { %577 = dma.done.wait [#allocation6], 16  }
 0x500   :  { %578 = vsyncadd [#allocation6], 4294967280 }
 0x501   :  { %579 = dma.done.wait [#allocation9], 32  }
 0x502   :  { %580 = vsyncadd [#allocation9], 4294967264 }
 0x503   :  { %381 = vsyncpa [#allocation5], 1 }
 0x504   :  { %382 = vsyncpa [#allocation6], 1 }
 0x505   :  { %383 = vsyncpa [#allocation9], 1 }

</bundles_post_ra>
